<compile_context>
chip_gen: v6e
topology: v6e:2x2x1
jax: 0.10.0
libtpu: 0.0.40
codegen_flags: <defaults>
</compile_context>

<pallas_src>
import jax
import jax.numpy as jnp
from jax.experimental import pallas as pl
from jax.experimental.pallas import tpu as pltpu

NUM_NODES = 64        # N (nodes per graph)
HIDDEN = 32           # hidden_dim in the PyTorch module
INPUT_DIM = 1         # node_features = degree -> [N, 1]
BN_EPS = 1e-5
BATCH = 8             # number of graphs / requests
GROUP = 4             # graphs fused per grid step
GN = GROUP * NUM_NODES  # 256 lanes per step


def gnn_kernel(a_ref, x_ref, w_ref, p_ref, out_ref):
    """3x (GCNConv + folded-BN + ReLU) + Linear in transposed [H, GN] layout.

    a_ref:   [GN, GN]  bf16  block-diagonal GCN-normalized A_hat (symmetric)
    x_ref:   [1, GN]   bf16  node degrees of the GROUP graphs, lane-packed
    w_ref:   [2, H, H] bf16  BN-folded, transposed W2'^T, W3'^T
    p_ref:   [H, 8]    f32   cols = (w1', b1', b2', b3', wfc, bfc, 0, 0)
    out_ref: [1, GN]   f32   logits, lane-dense
    """
    a = a_ref[...]                                                   # [GN, GN]
    xr = x_ref[...]                                                  # [1, GN]

    # --- layer 1: X @ W1' is an outer product (input_dim == 1), in bf16 ----
    w1c = p_ref[:, 0:1].astype(jnp.bfloat16)                         # [H, 1]
    ht = jnp.dot(w1c * xr, a, preferred_element_type=jnp.float32)    # [H, GN]
    ht = jnp.maximum(ht + p_ref[:, 1:2], 0.0)                        # +b', ReLU
    # TODO(synk): dropout(p=0.3) omitted -- identity in eval mode.

    # --- layers 2 & 3: Ht' = relu(W'^T @ Ht @ A + b') -----------------------
    for layer in range(2):
        xw = jnp.dot(w_ref[layer], ht.astype(jnp.bfloat16),
                     preferred_element_type=jnp.float32)             # [H, GN]
        agg = jnp.dot(xw.astype(jnp.bfloat16), a,
                      preferred_element_type=jnp.float32)            # [H, GN]
        ht = jnp.maximum(agg + p_ref[:, 2 + layer:3 + layer], 0.0)

    # --- fc: logits^T = wfc^T @ Ht + bfc  -> lane-dense [1, GN] --------------
    logit = jnp.sum(ht * p_ref[:, 4:5], axis=0, keepdims=True)       # [1, GN]
    out_ref[...] = logit + p_ref[0:1, 5:6]


def gnn_forward(a_blk, x_pack, w_pack, p_pack):
    steps, gn, _ = a_blk.shape
    h = w_pack.shape[-1]

    # Advisory cost for XLA's scheduler (this call is latency-bound).
    flops_per_step = 3 * 2 * h * gn * gn + 2 * 2 * h * h * gn + 2 * h * gn
    bytes_accessed = (a_blk.size * 2 + x_pack.size * 2 + w_pack.size * 2
                      + p_pack.size * 4 + steps * gn * 4)

    return pl.pallas_call(
        gnn_kernel,
        out_shape=jax.ShapeDtypeStruct((steps, 1, gn), jnp.float32),
        grid=(steps,),
        in_specs=[
            pl.BlockSpec((None, gn, gn), lambda i: (i, 0, 0)),       # A block-diag
            pl.BlockSpec((None, 1, gn), lambda i: (i, 0, 0)),        # degree row
            pl.BlockSpec(w_pack.shape, lambda i: (0, 0, 0)),         # weights (resident)
            pl.BlockSpec(p_pack.shape, lambda i: (0, 0)),            # vector pack
        ],
        out_specs=pl.BlockSpec((None, 1, gn), lambda i: (i, 0, 0)),
        compiler_params=pltpu.CompilerParams(
            dimension_semantics=("parallel",),       # shard batch axis on v7x megacore
            vmem_limit_bytes=16 * 1024 * 1024),
        cost_estimate=pl.CostEstimate(
            flops=int(steps * flops_per_step),
            transcendentals=0,
            bytes_accessed=int(bytes_accessed)),
    )(a_blk, x_pack, w_pack, p_pack)


# ----------------------------- host-side setup ------------------------------

def _build_graph(n, g):
    """Small deterministic undirected graph (ring + graph-specific chords)."""
    src = list(range(n)) + [(i + 1) % n for i in range(n)]
    dst = [(i + 1) % n for i in range(n)] + list(range(n))
    extra = [(0, 5 + g), (0, 10 + 2 * g), (3 + g, 20),
             (7, (25 + 3 * g) % n), (31, (40 + g) % n)]
    for a, b in extra:
        src += [a, b]
        dst += [b, a]
    return jnp.array([src, dst], dtype=jnp.int32)                    # [2, E]


def _normalized_adjacency(edge_index, n):
    src, dst = edge_index[0], edge_index[1]
    a = jnp.zeros((n, n), jnp.float32).at[dst, src].set(1.0)         # j -> i
    a_tilde = a + jnp.eye(n, dtype=jnp.float32)                      # self loops
    deg = jnp.sum(a_tilde, axis=1)
    d_inv_sqrt = 1.0 / jnp.sqrt(deg)
    return a_tilde * d_inv_sqrt[:, None] * d_inv_sqrt[None, :]       # [N, N] symmetric


def _init_params(key):
    keys = jax.random.split(key, 8)
    scale = 0.2
    w1 = scale * jax.random.normal(keys[0], (INPUT_DIM, HIDDEN), jnp.float32)
    w2 = scale * jax.random.normal(keys[1], (HIDDEN, HIDDEN), jnp.float32)
    w3 = scale * jax.random.normal(keys[2], (HIDDEN, HIDDEN), jnp.float32)

    # per-layer [5, H] = (conv bias, bn gamma, bn beta, running_mean, running_var)
    def bn_block(k):
        k1, k2, k3, k4 = jax.random.split(k, 4)
        bias = jnp.zeros((HIDDEN,), jnp.float32)                     # GCNConv bias init
        gamma = 1.0 + 0.1 * jax.random.normal(k1, (HIDDEN,), jnp.float32)
        beta = 0.1 * jax.random.normal(k2, (HIDDEN,), jnp.float32)
        mean = 0.05 * jax.random.normal(k3, (HIDDEN,), jnp.float32)
        var = 1.0 + 0.1 * jnp.abs(jax.random.normal(k4, (HIDDEN,), jnp.float32))
        return jnp.stack([bias, gamma, beta, mean, var], axis=0)

    bn_stack = jnp.stack(
        [bn_block(keys[3]), bn_block(keys[4]), bn_block(keys[5])], axis=0)

    wfc = scale * jax.random.normal(keys[6], (HIDDEN, 1), jnp.float32)
    bfc = 0.1 * jax.random.normal(keys[7], (), jnp.float32)
    return (w1, w2, w3), bn_stack, wfc, bfc


def _fold_params(ws, bn_stack, wfc, bfc):
    """Fold BN(eval) + conv bias into weights; pack for the transposed kernel."""
    folded_w, folded_b = [], []
    for layer, w in enumerate(ws):
        bias, gamma, beta, mean, var = bn_stack[layer]
        s = gamma * jax.lax.rsqrt(var + BN_EPS)
        folded_w.append(w * s[None, :])
        folded_b.append((bias - mean) * s + beta)

    # transposed bf16 matmul weights for layers 2 & 3 (kernel does W'^T @ Ht)
    w_pack = jnp.stack([folded_w[1].T, folded_w[2].T], axis=0).astype(jnp.bfloat16)
    # f32 column pack [H, 8]: w1' (input_dim==1), three fused biases, fc w, fc b
    p_pack = jnp.stack([
        folded_w[0][0],                              # col 0: w1' (folded)
        folded_b[0],                                 # col 1: b1'
        folded_b[1],                                 # col 2: b2'
        folded_b[2],                                 # col 3: b3'
        wfc[:, 0],                                   # col 4: fc weight column
        jnp.full((HIDDEN,), bfc, jnp.float32),       # col 5: fc bias (broadcast)
        jnp.zeros((HIDDEN,), jnp.float32),           # col 6: pad
        jnp.zeros((HIDDEN,), jnp.float32),           # col 7: pad
    ], axis=1)                                       # -> [H, 8]
    return w_pack, p_pack


def _reference_forward(a_hat, x, ws, bn_stack, wfc, bfc):
    """Unfused f32 reference (matches the PyTorch eval-mode forward)."""
    h = x
    for layer, w in enumerate(ws):
        bias, gamma, beta, mean, var = bn_stack[layer]
        h = a_hat @ (h @ w) + bias[None, :]
        h = (h - mean[None, :]) / jnp.sqrt(var[None, :] + BN_EPS) * gamma[None, :] \
            + beta[None, :]
        h = jnp.maximum(h, 0.0)
    return h @ wfc + bfc


if __name__ == "__main__":
    key = jax.random.PRNGKey(0)

    # --- build BATCH deterministic graphs, their A_hat and degree features ---
    a_hats, degrees = [], []
    node_ids = jnp.arange(NUM_NODES)
    for g in range(BATCH):
        ei = _build_graph(NUM_NODES, g)
        a_hats.append(_normalized_adjacency(ei, NUM_NODES))
        deg = jnp.sum(ei[0][None, :] == node_ids[:, None], axis=1).astype(jnp.float32)
        degrees.append(deg)
    a_hats = jnp.stack(a_hats)                       # [B, N, N] f32
    degrees = jnp.stack(degrees)                     # [B, N]    f32

    steps = BATCH // GROUP
    # block-diagonal A_hat per group of GROUP graphs (no cross-graph mixing)
    a_blk = jnp.zeros((steps, GN, GN), jnp.float32)
    for s in range(steps):
        for g in range(GROUP):
            b = s * GROUP + g
            lo, hi = g * NUM_NODES, (g + 1) * NUM_NODES
            a_blk = a_blk.at[s, lo:hi, lo:hi].set(a_hats[b])
    a_blk = a_blk.astype(jnp.bfloat16)
    # degree rows packed along lanes (small integer degrees are exact in bf16)
    x_pack = degrees.reshape(steps, 1, GN).astype(jnp.bfloat16)

    ws, bn_stack, wfc, bfc = _init_params(key)
    w_pack, p_pack = _fold_params(ws, bn_stack, wfc, bfc)

    out = gnn_forward(a_blk, x_pack, w_pack, p_pack)  # [steps, 1, GN]
    out = jax.block_until_ready(out)
    logits = out.reshape(BATCH, NUM_NODES, 1)

    ref = jnp.stack([
        _reference_forward(a_hats[b], degrees[b][:, None], ws, bn_stack, wfc, bfc)
        for b in range(BATCH)
    ])                                               # [B, N, 1]

    assert logits.shape == (BATCH, NUM_NODES, 1)
    # bf16 MXU inputs with f32 accumulation -> loosened tolerance vs f32 reference
    assert jnp.allclose(logits, ref, atol=5e-2, rtol=5e-2), "mismatch vs JAX reference"

    print("KERNEL_OK")
</pallas_src>

<mosaic_0001>
module attributes {stable_mosaic.version = 11 : i64} {
  func.func @gnn_kernel(%arg0: i32, %arg1: memref<1x256x256xbf16, #tpu.memory_space<vmem>>, %arg2: memref<1x1x256xbf16, #tpu.memory_space<vmem>>, %arg3: memref<2x32x32xbf16, #tpu.memory_space<vmem>>, %arg4: memref<32x8xf32, #tpu.memory_space<vmem>>, %arg5: memref<1x1x256xf32, #tpu.memory_space<vmem>>) attributes {dimension_semantics = [#tpu.dimension_semantics<parallel>], iteration_bounds = array<i64: 2>, scalar_prefetch = 0 : i64, scratch_operands = 0 : i64, tpu.core_type = #tpu.core_type<tc>, window_params = [{transform_indices = @transform_0, window_bounds = array<i64: 1, 256, 256>}, {transform_indices = @transform_1, window_bounds = array<i64: 1, 1, 256>}, {pipeline_mode = #tpu.pipeline_mode<synchronous>, transform_indices = @transform_2, window_bounds = array<i64: 2, 32, 32>}, {pipeline_mode = #tpu.pipeline_mode<synchronous>, transform_indices = @transform_3, window_bounds = array<i64: 32, 8>}, {transform_indices = @transform_4, window_bounds = array<i64: 1, 1, 256>}]} {
    %c0 = arith.constant 0 : index
    %c0_0 = arith.constant 0 : index
    %c0_1 = arith.constant 0 : index
    %0 = vector.load %arg1[%c0, %c0_0, %c0_1] : memref<1x256x256xbf16, #tpu.memory_space<vmem>>, vector<1x256x256xbf16>
    %1 = vector.shape_cast %0 : vector<1x256x256xbf16> to vector<256x256xbf16>
    %c0_2 = arith.constant 0 : index
    %c0_3 = arith.constant 0 : index
    %c0_4 = arith.constant 0 : index
    %2 = vector.load %arg2[%c0_2, %c0_3, %c0_4] : memref<1x1x256xbf16, #tpu.memory_space<vmem>>, vector<1x1x256xbf16>
    %3 = vector.shape_cast %2 : vector<1x1x256xbf16> to vector<1x256xbf16>
    %c0_5 = arith.constant 0 : index
    %c0_6 = arith.constant 0 : index
    %4 = vector.load %arg4[%c0_5, %c0_6] : memref<32x8xf32, #tpu.memory_space<vmem>>, vector<32x1xf32>
    %5 = arith.truncf %4 : vector<32x1xf32> to vector<32x1xbf16>
    %6 = vector.broadcast %5 : vector<32x1xbf16> to vector<32x256xbf16>
    %7 = vector.broadcast %3 : vector<1x256xbf16> to vector<32x256xbf16>
    %8 = arith.mulf %6, %7 : vector<32x256xbf16>
    %cst = arith.constant dense<0.000000e+00> : vector<32x256xf32>
    %9 = tpu.matmul %8, %1, %cst {dimension_numbers = #tpu.dot_dimension_numbers<[1], [0], [0], [1], [0, 0, 1, 1], [], []>} : vector<32x256xbf16>, vector<256x256xbf16>, vector<32x256xf32> -> vector<32x256xf32>
    %c0_7 = arith.constant 0 : index
    %c1 = arith.constant 1 : index
    %10 = vector.load %arg4[%c0_7, %c1] : memref<32x8xf32, #tpu.memory_space<vmem>>, vector<32x1xf32>
    %11 = vector.broadcast %10 : vector<32x1xf32> to vector<32x256xf32>
    %12 = arith.addf %9, %11 : vector<32x256xf32>
    %cst_8 = arith.constant 0.000000e+00 : f32
    %13 = vector.broadcast %cst_8 : f32 to vector<32x256xf32>
    %14 = arith.maximumf %12, %13 : vector<32x256xf32>
    %c0_9 = arith.constant 0 : index
    %c0_10 = arith.constant 0 : index
    %c0_11 = arith.constant 0 : index
    %15 = vector.load %arg3[%c0_9, %c0_10, %c0_11] : memref<2x32x32xbf16, #tpu.memory_space<vmem>>, vector<1x32x32xbf16>
    %16 = vector.shape_cast %15 : vector<1x32x32xbf16> to vector<32x32xbf16>
    %17 = arith.truncf %14 : vector<32x256xf32> to vector<32x256xbf16>
    %cst_12 = arith.constant dense<0.000000e+00> : vector<32x256xf32>
    %18 = tpu.matmul %16, %17, %cst_12 {dimension_numbers = #tpu.dot_dimension_numbers<[1], [0], [0], [1], [0, 0, 1, 1], [], []>} : vector<32x32xbf16>, vector<32x256xbf16>, vector<32x256xf32> -> vector<32x256xf32>
    %19 = arith.truncf %18 : vector<32x256xf32> to vector<32x256xbf16>
    %cst_13 = arith.constant dense<0.000000e+00> : vector<32x256xf32>
    %20 = tpu.matmul %19, %1, %cst_13 {dimension_numbers = #tpu.dot_dimension_numbers<[1], [0], [0], [1], [0, 0, 1, 1], [], []>} : vector<32x256xbf16>, vector<256x256xbf16>, vector<32x256xf32> -> vector<32x256xf32>
    %c0_14 = arith.constant 0 : index
    %c2 = arith.constant 2 : index
    %21 = vector.load %arg4[%c0_14, %c2] : memref<32x8xf32, #tpu.memory_space<vmem>>, vector<32x1xf32>
    %22 = vector.broadcast %21 : vector<32x1xf32> to vector<32x256xf32>
    %23 = arith.addf %20, %22 : vector<32x256xf32>
    %cst_15 = arith.constant 0.000000e+00 : f32
    %24 = vector.broadcast %cst_15 : f32 to vector<32x256xf32>
    %25 = arith.maximumf %23, %24 : vector<32x256xf32>
    %c1_16 = arith.constant 1 : index
    %c0_17 = arith.constant 0 : index
    %c0_18 = arith.constant 0 : index
    %26 = vector.load %arg3[%c1_16, %c0_17, %c0_18] : memref<2x32x32xbf16, #tpu.memory_space<vmem>>, vector<1x32x32xbf16>
    %27 = vector.shape_cast %26 : vector<1x32x32xbf16> to vector<32x32xbf16>
    %28 = arith.truncf %25 : vector<32x256xf32> to vector<32x256xbf16>
    %cst_19 = arith.constant dense<0.000000e+00> : vector<32x256xf32>
    %29 = tpu.matmul %27, %28, %cst_19 {dimension_numbers = #tpu.dot_dimension_numbers<[1], [0], [0], [1], [0, 0, 1, 1], [], []>} : vector<32x32xbf16>, vector<32x256xbf16>, vector<32x256xf32> -> vector<32x256xf32>
    %30 = arith.truncf %29 : vector<32x256xf32> to vector<32x256xbf16>
    %cst_20 = arith.constant dense<0.000000e+00> : vector<32x256xf32>
    %31 = tpu.matmul %30, %1, %cst_20 {dimension_numbers = #tpu.dot_dimension_numbers<[1], [0], [0], [1], [0, 0, 1, 1], [], []>} : vector<32x256xbf16>, vector<256x256xbf16>, vector<32x256xf32> -> vector<32x256xf32>
    %c0_21 = arith.constant 0 : index
    %c3 = arith.constant 3 : index
    %32 = vector.load %arg4[%c0_21, %c3] : memref<32x8xf32, #tpu.memory_space<vmem>>, vector<32x1xf32>
    %33 = vector.broadcast %32 : vector<32x1xf32> to vector<32x256xf32>
    %34 = arith.addf %31, %33 : vector<32x256xf32>
    %cst_22 = arith.constant 0.000000e+00 : f32
    %35 = vector.broadcast %cst_22 : f32 to vector<32x256xf32>
    %36 = arith.maximumf %34, %35 : vector<32x256xf32>
    %c0_23 = arith.constant 0 : index
    %c4 = arith.constant 4 : index
    %37 = vector.load %arg4[%c0_23, %c4] : memref<32x8xf32, #tpu.memory_space<vmem>>, vector<32x1xf32>
    %38 = vector.broadcast %37 : vector<32x1xf32> to vector<32x256xf32>
    %39 = arith.mulf %36, %38 : vector<32x256xf32>
    %cst_24 = arith.constant dense<0.000000e+00> : vector<256xf32>
    %40 = vector.multi_reduction <add>, %39, %cst_24 [0] : vector<32x256xf32> to vector<256xf32>
    %41 = vector.shape_cast %40 : vector<256xf32> to vector<1x256xf32>
    %c0_25 = arith.constant 0 : index
    %c5 = arith.constant 5 : index
    %42 = vector.load %arg4[%c0_25, %c5] : memref<32x8xf32, #tpu.memory_space<vmem>>, vector<1x1xf32>
    %43 = vector.broadcast %42 : vector<1x1xf32> to vector<1x256xf32>
    %44 = arith.addf %41, %43 : vector<1x256xf32>
    %c0_26 = arith.constant 0 : index
    %c0_27 = arith.constant 0 : index
    %c0_28 = arith.constant 0 : index
    %45 = vector.load %arg5[%c0_26, %c0_27, %c0_28] : memref<1x1x256xf32, #tpu.memory_space<vmem>>, vector<1x1x256xf32>
    %46 = vector.shape_cast %45 : vector<1x1x256xf32> to vector<1x256xf32>
    %47 = vector.shape_cast %44 : vector<1x256xf32> to vector<1x1x256xf32>
    tpu.vector_store %arg5[%c0_26, %c0_27, %c0_28], %47 {strides = array<i32>} : memref<1x1x256xf32, #tpu.memory_space<vmem>>, vector<1x1x256xf32>,
    return
  }
  func.func @transform_0(%arg0: i32) -> (i32, i32, i32) {
    %c0_i32 = arith.constant 0 : i32
    %c0_i32_0 = arith.constant 0 : i32
    %c0_i32_1 = arith.constant 0 : i32
    return %arg0, %c0_i32, %c0_i32_0 : i32, i32, i32
  }
  func.func @transform_1(%arg0: i32) -> (i32, i32, i32) {
    %c0_i32 = arith.constant 0 : i32
    %c0_i32_0 = arith.constant 0 : i32
    %c0_i32_1 = arith.constant 0 : i32
    return %arg0, %c0_i32, %c0_i32_0 : i32, i32, i32
  }
  func.func @transform_2(%arg0: i32) -> (i32, i32, i32) {
    %c0_i32 = arith.constant 0 : i32
    %c0_i32_0 = arith.constant 0 : i32
    %c0_i32_1 = arith.constant 0 : i32
    %c0_i32_2 = arith.constant 0 : i32
    return %c0_i32, %c0_i32_0, %c0_i32_1 : i32, i32, i32
  }
  func.func @transform_3(%arg0: i32) -> (i32, i32) {
    %c0_i32 = arith.constant 0 : i32
    %c0_i32_0 = arith.constant 0 : i32
    %c0_i32_1 = arith.constant 0 : i32
    return %c0_i32, %c0_i32_0 : i32, i32
  }
  func.func @transform_4(%arg0: i32) -> (i32, i32, i32) {
    %c0_i32 = arith.constant 0 : i32
    %c0_i32_0 = arith.constant 0 : i32
    %c0_i32_1 = arith.constant 0 : i32
    return %arg0, %c0_i32, %c0_i32_0 : i32, i32, i32
  }
}

</mosaic_0001>

<bundles_post_ra>
// kernel: tpu_custom_call.1
= control target key start
LH: loop header
LB: loop body
LE: loop exit
PB: predicated region body
PF: predicated region fallthrough
CT: control target
= control target key end

     0   :  { %9 = vsyncpa [#allocation3], 0  ;;  %s1778_s0 = inlined_call_operand.hbm [shape: bf16[2,256,256], index: 0, kind: input, shape index: {}]   ;;  %s1779_s1 = inlined_call_operand.vmem [shape: bf16[2,1,256], index: 1, kind: input, shape index: {}]   ;;  %s1780_s2 = inlined_call_operand.vmem [shape: bf16[2,32,32], index: 2, kind: input, shape index: {}]   ;;  %s1781_s3 = inlined_call_operand.vmem [shape: f32[32,8], index: 3, kind: input, shape index: {}]   ;;  %s1782_s4 = inlined_call_operand.hbm [shape: f32[2,1,256], index: 4, kind: output, shape index: {}]  }
   0x1   :  { %11 = vsyncpa [#allocation3 + $0x1], 0 }
   0x2   :  { %12 = vsyncpa [#allocation4], 0 }
   0x3   :  { %14 = vsyncpa [#allocation4 + $0x1], 0  ;;  %s1366_s15 = smov 0   ;;  %s1368_s16 = smov 0  }
   0x4   :  { %s1370_s17 = smov 0   ;;  %s1372_s18 = smov 0  }
   0x5 LB: > { %s1387_s19 = sadd.s32 4294967295, %s1328_s18   ;;  %s1057_s20 = sadd.s32 4294967294, %s1328_s18   ;;  %s1328_s18 = sphi %s1372_s18, %s1809_s18   ;;  %s1324_s17 = sphi %s1370_s17, %s1808_s17   ;;  %s1320_s16 = sphi %s1368_s16, %s1807_s16   ;;  %s1316_s15 = sphi %s1366_s15, %s1806_s15  }
   0x6   : > { %s1391_s21 = sadd.s32 1, %s1328_s18   ;;  %s27_s22 = sadd.s32 1, %s1324_s17 }
   0x7   : > { %s24_s23 = ssub.s32 %s1328_s18, %s1391_s21  ;;  %p34_p0 = scmp.ne.s32.totalorder %s1324_s17, %s1320_s16 }
   0x8   : > { %p25_p1 = scmp.eq.s32.totalorder %s24_s23, 0  ;;  %p35_p2 = scmp.eq.s32.totalorder %s1328_s18, 0 }
   0x9   : > { %p40_p3 = scmp.ne.s32.totalorder %s1320_s16, %s1316_s15  ;;  %p41_p4 = scmp.eq.s32.totalorder %s1387_s19, 0 }
   0xa   : > { %s1403_s24 = scalar_select %p25_p1, %s1324_s17, %s27_s22  }
   0xb   : > { %p1405_p5 = por %p35_p2, %p34_p0  ;;  %p1409_p6 = por %p41_p4, %p40_p3 }
   0xc   : > { %p132_p7 = scmp.eq.s32.totalorder %s1387_s19, 1  ;;  %p138_p8 = scmp.eq.s32.totalorder %s1057_s20, 1 }
   0xd   : > { %s1792_s26 = scalar_select %p1409_p6, 1, 0 }
   0xe   : > { %p1131_p10 = scmp.lt.s32.totalorder %s1328_s18, 2  ;;  %p1416_p11 = por %p132_p7, %p34_p0 }
   0xf   : > { %p1420_p12 = por %p138_p8, %p40_p3  ;;  %s164_s29 = sand.u32 1, %s1324_s17  }
  0x10   : > { %s1793_s27 = scalar_select %p1416_p11, 1, 0 }
  0x11   : > { %s1794_s28 = scalar_select %p1420_p12, 1, 0 }
  0x12   : > { %s1117_s30 = sshll.u32 %s1328_s18, 12  ;;  %s1060_s5 = sshll.u32 %s164_s29, 8 }
  0x13   : > { %s1429_s8 = scalar_lea.hbm %s1778_s0, %s1117_s30  ;;  %s168_s9 = scalar_lea.vmem [#allocation2], %s1060_s5 }
  0x14   : > { %s175_s10 = sshll.u32 %s168_s9, 4  ;;  %p1433_p13 = pnand %p1131_p10, %p1405_p5  ;;  %s1437_s10 = int_to_ptr.vmem [resolvable:$true] %s175_s10 }
  0x15   : > { %s1439_s12 = scalar_lea.sflag [#allocation3], %s164_s29  ;;  %s1236_s13 = scalar_lea.hbm %s1429_s8, 4096 }
  0x16   : > { %p1237_p0 = scmp.ne.s32.totalorder %s1429_s8, %s1236_s13  ;;  %p1238_p1 = pneg %p1433_p13 }
  0x17   : > { %s1241_s22 = scalar_lea.hbm %s1778_s0, 8192  ;;  %p1242_p4 = scmp.lt.s32.totalorder %s1429_s8, %s1778_s0 }
  0x18   : > { %p1239_p2 = pnand %p1238_p1, %p1237_p0  ;;  %p1243_p5 = scmp.lt.s32.totalorder %s1241_s22, %s1236_s13 }
  0x1a   : > { %p1240_p3 = pneg %p1239_p2  ;;  %p1244_p7 = por %p1243_p5, %p1242_p4 }
  0x1c   : > { %p1245_p8 = pnand %p1244_p7, %p1240_p3 }
  0x1e   : > { %1248 = shalt.err (!%p1245_p8)
}
  0x1f   : > { %s1249_s29 = scalar_lea.vmem %s1437_s10, 4096  ;;  %s1330_s30 = smov [#allocation2]  }
  0x20   : > { %p1250_p10 = scmp.ne.s32.totalorder %s1437_s10, %s1249_s29  ;;  %s1254_s5 = sshll.u32 %s1330_s30, 4  ;;  %s1255_s5 = int_to_ptr.vmem [resolvable:$false] %s1254_s5 }
  0x21   : > { %s1256_s6 = scalar_lea.vmem %s1255_s5, 8192  ;;  %p1257_p2 = scmp.lt.s32.totalorder %s1437_s10, %s1255_s5 }
  0x22   : > { %p1252_p9 = pnand %p1250_p10, %p1238_p1  ;;  %p1258_p12 = scmp.lt.s32.totalorder %s1256_s6, %s1249_s29 }
  0x24   : > { %p1253_p0 = pneg %p1252_p9  ;;  %p1259_p11 = por %p1258_p12, %p1257_p2 }
  0x26   : > { %p1260_p6 = pnand %p1259_p11, %p1253_p0 }
  0x28   : > { %1263 = shalt.err (!%p1260_p6)
}
  0x29   : > { %s1331_s7 = smov 128   ;;  %s1332_s9 = smov 8  }
  0x2a   : > { %1126 = dma.hbm_to_vmem [thread:$0]  (!%p1433_p13), %s1429_s8, 4096, %s1437_s10, %s1439_s12, %s1331_s7, %s1331_s7, %s1332_s9  }
  0x2b   : > { %p1063_p9 = scmp.ge.s32.totalorder %s1328_s18, 1  ;;  %p190_p1 = scmp.lt.s32.totalorder %s1328_s18, 3 }
  0x2d   : > { %p191_p3 = pnand %p1063_p9, %p190_p1 }
  0x2f   : > { %194 = sbr.rel (%p191_p3) target bundleno = 1280 (0x500), region = 36 }
  0x34   : > { %s1463_s13 = sand.u32 1, %s1320_s16   ;;  %p1796_p6 = scmp.ne.s32.totalorder %s1792_s26, 0 }
  0x35   : > { %s1064_s14 = sshll.u32 %s1463_s13, 8  ;;  %s197_s20 = scalar_lea.sflag [#allocation3], %s1463_s13 }
  0x36   : > { %s1467_s22 = scalar_lea.vmem [#allocation2], %s1064_s14 }
  0x37   : > { %1307 = dma.done.wait (%p1796_p6), %s197_s20, 4096  }
  0x38   : > { %1309 = vsyncadd (%p1796_p6), %s197_s20, 4294963200  ;;  %v1786_v0 = vmov 0   ;;  %v1477_v1 = vld [vmem:[%s1781_s3] sm:$0xff]  ;;  %v1482_v2 = vld [vmem:[%s1781_s3 + $0x8] sm:$0xff]  ;;  %v1334_v14 = vmov 1   ;;  %p229_p11 = scmp.lt.s32.totalorder %s1387_s19, 1  ;;  %v1785_v42 = vlaneseq }
  0x39   : > { %1174 = vset.pattern.permute.xlu0 %v1786_v0  ;;  %v1487_v3 = vld [vmem:[%s1781_s3 + $0x10] sm:$0xff]  ;;  %v271_v4 = vpack.c.bf16 %v1482_v2, %v1477_v1  ;;  %v1494_v5 = vld [vmem:[%s1781_s3 + $0x18] sm:$0xff]  ;;  %v1505_v9 = vld [vmem:[%s1467_s22 + $0x64] ss:$8 sps:$4 sm:$0xff]   ;;  %1175 = vset.pattern.permute.xlu1 %v1334_v14  ;;  %v1335_v40 = vmov 1966171168  }
  0x3a   : > { %v1497_v6 = vld [vmem:[%s1467_s22 + $0x74] ss:$8 sps:$4 sm:$0xff]   ;;  %v1500_v7 = vld [vmem:[%s1467_s22 + $0x70] ss:$8 sps:$4 sm:$0xff]   ;;  %v272_v8 = vpack.c.bf16 %v1494_v5, %v1487_v3  ;;  %v1511_v10 = vld [vmem:[%s1467_s22 + $0x60] ss:$8 sps:$4 sm:$0xff]   ;;  %340 = vperm.xlu1 %1175, %v1487_v3   ;;  %v293_v41 = vunpack.c.l.s4 %v1335_v40 }
  0x3b   : > { %275 = vperm.xlu0 %1174, %v271_v4   ;;  %508 = vmatprep.subr.bf16.mxu0 %v1497_v6  ;;  %v1516_v11 = vld [vmem:[%s1467_s22 + $0x54] ss:$8 sps:$4 sm:$0xff]   ;;  %v1521_v12 = vld [vmem:[%s1467_s22 + $0x50] ss:$8 sps:$4 sm:$0xff]   ;;  %v1526_v13 = vld [vmem:[%s1467_s22 + $0x44] ss:$8 sps:$4 sm:$0xff]  }
  0x3c   : > { %667 = vmatprep.subr.bf16.mxu1 %v1497_v6  ;;  %509 = vmatpush1.bf16.msra.mxu0 %v1500_v7  ;;  %v1533_v15 = vld [vmem:[%s1467_s22 + $0x40] ss:$8 sps:$4 sm:$0xff]   ;;  %v1538_v16 = vld [vmem:[%s1467_s22 + $0x34] ss:$8 sps:$4 sm:$0xff]   ;;  %v1544_v17 = vld [vmem:[%s1467_s22 + $0x30] ss:$8 sps:$4 sm:$0xff]   ;;  %v294_v43 = vunpack.c.0.s8 %v293_v41 }
  0x3d   : > { %668 = vmatpush1.bf16.msra.mxu1 %v1500_v7  ;;  %510 = vmatprep.subr.bf16.mxu0 %v1505_v9  ;;  %v1549_v18 = vld [vmem:[%s1467_s22 + $0x24] ss:$8 sps:$4 sm:$0xff]   ;;  %v1555_v19 = vld [vmem:[%s1467_s22 + $0x20] ss:$8 sps:$4 sm:$0xff]   ;;  %v1560_v20 = vld [vmem:[%s1467_s22 + $0x14] ss:$8 sps:$4 sm:$0xff]  }
  0x3e   : > { %669 = vmatprep.subr.bf16.mxu1 %v1505_v9  ;;  %345 = vperm.xlu1 %1175, %v1494_v5   ;;  %v1564_v21 = vld [vmem:[%s1467_s22 + $0x10] ss:$8 sps:$4 sm:$0xff]   ;;  %v1570_v22 = vld [vmem:[%s1467_s22 + $0x4] ss:$8 sps:$4 sm:$0xff]   ;;  %v1575_v23 = vld [vmem:[%s1467_s22] ss:$8 sps:$4 sm:$0xff]  }
  0x3f   : > { %280 = vperm.xlu0 %1174, %v272_v8   ;;  %v1580_v24 = vld [vmem:[%s1467_s22 + $0xf4] ss:$8 sps:$4 sm:$0xff]   ;;  %v1585_v25 = vld [vmem:[%s1467_s22 + $0xf0] ss:$8 sps:$4 sm:$0xff]   ;;  %v1590_v26 = vld [vmem:[%s1467_s22 + $0xe4] ss:$8 sps:$4 sm:$0xff]  }
  0x40   : > { %511 = vmatpush1.bf16.msra.mxu0 %v1511_v10  ;;  %v1595_v27 = vld [vmem:[%s1467_s22 + $0xe0] ss:$8 sps:$4 sm:$0xff]   ;;  %v1600_v28 = vld [vmem:[%s1467_s22 + $0xd4] ss:$8 sps:$4 sm:$0xff]   ;;  %v1605_v29 = vld [vmem:[%s1467_s22 + $0xd0] ss:$8 sps:$4 sm:$0xff]  }
  0x41   : > { %670 = vmatpush1.bf16.msra.mxu1 %v1511_v10  ;;  %512 = vmatprep.subr.bf16.mxu0 %v1516_v11  ;;  %v1610_v30 = vld [vmem:[%s1467_s22 + $0xc4] ss:$8 sps:$4 sm:$0xff]   ;;  %v1615_v31 = vld [vmem:[%s1467_s22 + $0xc0] ss:$8 sps:$4 sm:$0xff]   ;;  %v1620_v32 = vld [vmem:[%s1467_s22 + $0xb4] ss:$8 sps:$4 sm:$0xff]  }
  0x42   : > { %671 = vmatprep.subr.bf16.mxu1 %v1516_v11  ;;  %335 = vperm.xlu1 %1175, %v1482_v2   ;;  %v1625_v33 = vld [vmem:[%s1467_s22 + $0xb0] ss:$8 sps:$4 sm:$0xff]   ;;  %v1630_v34 = vld [vmem:[%s1467_s22 + $0xa4] ss:$8 sps:$4 sm:$0xff]   ;;  %v1635_v35 = vld [vmem:[%s1467_s22 + $0xa0] ss:$8 sps:$4 sm:$0xff]  }
  0x43   : > { %1176 = vset.pattern.permute.xlu0 %v1334_v14  ;;  %v1640_v36 = vld [vmem:[%s1467_s22 + $0x94] ss:$8 sps:$4 sm:$0xff]   ;;  %v1645_v37 = vld [vmem:[%s1467_s22 + $0x90] ss:$8 sps:$4 sm:$0xff]   ;;  %v1650_v38 = vld [vmem:[%s1467_s22 + $0x84] ss:$8 sps:$4 sm:$0xff]  }
  0x44   : > { %330 = vperm.xlu0 %1176, %v1477_v1   ;;  %513 = vmatpush1.bf16.msra.mxu0 %v1521_v12  ;;  %v1655_v39 = vld [vmem:[%s1467_s22 + $0x80] ss:$8 sps:$4 sm:$0xff]   ;;  %s230_s30 = scalar_select %p229_p11, %s1387_s19, 1  ;;  %v296_v44 = vshrl.u32 %v1785_v42, 7  ;;  %vm587_vm0 = vcmask 261120  }
  0x45   : > { %672 = vmatpush1.bf16.msra.mxu1 %v1521_v12  ;;  %514 = vmatprep.subr.bf16.mxu0 %v1526_v13  ;;  %1797 = vst [vmem:[#allocation8_spill] sm:$0xff] %v1655_v39  ;;  %s1065_s29 = sshll.u32 %s1463_s13, 1  ;;  %s961_s20 = scalar_lea.sflag [#allocation4], %s1463_s13 }
  0x46   : > { %673 = vmatprep.subr.bf16.mxu1 %v1526_v13  ;;  %s1066_s5 = sshll.u32 %s230_s30, 1  ;;  %v1669_v46 = vsub.s32 %v294_v43, %v296_v44  ;;  %v311_v50 = vsub.s32 0, %v296_v44  ;;  %s1118_s30 = sshll.u32 %s1387_s19, 5 }
  0x47   : > { %s232_s9 = scalar_lea.vmem %s1779_s1, %s1066_s5  ;;  %s228_s5 = scalar_lea.vmem [#allocation5], %s1065_s29 }
  0x48   : > { %515 = vmatpush1.bf16.msra.mxu0 %v1533_v15  ;;  %v1067_v45 = vld.sshfl [vmem:[%s232_s9] sm:$0x11 pattern:$0x75316420]  ;;  %1798 = vst [vmem:[#allocation9_spill] sm:$0xff] %v1669_v46  ;;  %s975_s6 = sshll.u32 %s228_s5, 4  ;;  %s973_s14 = scalar_lea.hbm %s1782_s4, %s1118_s30  ;;  %s976_s6 = int_to_ptr.vmem [resolvable:$true] %s975_s6 }
  0x49   : > { %674 = vmatpush1.bf16.msra.mxu1 %v1533_v15  ;;  %516 = vmatprep.subr.bf16.mxu0 %v1538_v16  ;;  %v291_v47 = vcombine.high %v1067_v45, %v1067_v45  ;;  %v298_v48 = vrot.slane %v1067_v45, %v1669_v46  ;;  %s1264_s22 = scalar_lea.vmem %s976_s6, 32  ;;  %p1803_p13 = scmp.ne.s32.totalorder %s1793_s27, 0 }
  0x4a   : > { %675 = vmatprep.subr.bf16.mxu1 %v1538_v16  ;;  %p1265_p12 = scmp.ne.s32.totalorder %s976_s6, %s1264_s22  ;;  %s1340_s19 = smov [#allocation5]  }
  0x4b   : > { %v305_v49 = vrot.slane %v291_v47, %v1669_v46  ;;  %v307_v51 = vpack.i.b16 %v298_v48, %v298_v48  ;;  %s1268_s8 = sshll.u32 %s1340_s19, 4  ;;  %s1269_s8 = int_to_ptr.vmem [resolvable:$false] %s1268_s8 }
  0x4c   : > { %517 = vmatpush1.bf16.msra.mxu0 %v1544_v17  ;;  %p1266_p4 = pnand %p1265_p12, %p1803_p13  ;;  %s1270_s10 = scalar_lea.vmem %s1269_s8, 64 }
  0x4d   : > { %676 = vmatpush1.bf16.msra.mxu1 %v1544_v17  ;;  %518 = vmatprep.subr.bf16.mxu0 %v1549_v18  ;;  %v314_v52 = vpack.i.b16 %v305_v49, %v305_v49  ;;  %v312_v53 = vrot.slane %v307_v51, %v311_v50  ;;  %p1271_p7 = scmp.lt.s32.totalorder %s976_s6, %s1269_s8  ;;  %p1272_p8 = scmp.lt.s32.totalorder %s1270_s10, %s1264_s22 }
  0x4e   : > { %677 = vmatprep.subr.bf16.mxu1 %v1549_v18  ;;  %p1267_p5 = pneg %p1266_p4 }
  0x4f   : > { %v319_v54 = vrot.slane %v314_v52, %v311_v50  ;;  %p1273_p10 = por %p1272_p8, %p1271_p7 }
  0x50   : > { %519 = vmatpush1.bf16.msra.mxu0 %v1555_v19 }
  0x51   : > { %678 = vmatpush1.bf16.msra.mxu1 %v1555_v19  ;;  %520 = vmatprep.subr.bf16.mxu0 %v1560_v20  ;;  %p1274_p0 = pnand %p1273_p10, %p1267_p5 }
  0x52   : > { %679 = vmatprep.subr.bf16.mxu1 %v1560_v20 }
  0x54   : > { %521 = vmatpush1.bf16.msra.mxu0 %v1564_v21 }
  0x55   : > { %680 = vmatpush1.bf16.msra.mxu1 %v1564_v21  ;;  %522 = vmatprep.subr.bf16.mxu0 %v1570_v22 }
  0x56   : > { %681 = vmatprep.subr.bf16.mxu1 %v1570_v22 }
  0x58   : > { %523 = vmatpush1.bf16.msra.mxu0 %v1575_v23 }
  0x59   : > { %682 = vmatpush1.bf16.msra.mxu1 %v1575_v23  ;;  %524 = vmatprep.subr.bf16.mxu0 %v1580_v24 }
  0x5a   : > { %683 = vmatprep.subr.bf16.mxu1 %v1580_v24 }
  0x5c   : > { %525 = vmatpush2.bf16.msra.mxu0 %v1585_v25 }
  0x5d   : > { %684 = vmatpush2.bf16.msra.mxu1 %v1585_v25  ;;  %526 = vmatprep.subr.bf16.mxu0 %v1590_v26 }
  0x5e   : > { %685 = vmatprep.subr.bf16.mxu1 %v1590_v26 }
  0x60   : > { %527 = vmatpush2.bf16.msra.mxu0 %v1595_v27 }
  0x61   : > { %686 = vmatpush2.bf16.msra.mxu1 %v1595_v27  ;;  %528 = vmatprep.subr.bf16.mxu0 %v1600_v28 }
  0x62   : > { %687 = vmatprep.subr.bf16.mxu1 %v1600_v28 }
  0x64   : > { %529 = vmatpush2.bf16.msra.mxu0 %v1605_v29 }
  0x65   : > { %688 = vmatpush2.bf16.msra.mxu1 %v1605_v29  ;;  %530 = vmatprep.subr.bf16.mxu0 %v1610_v30 }
  0x66   : > { %689 = vmatprep.subr.bf16.mxu1 %v1610_v30 }
  0x68   : > { %531 = vmatpush2.bf16.msra.mxu0 %v1615_v31 }
  0x69   : > { %690 = vmatpush2.bf16.msra.mxu1 %v1615_v31  ;;  %532 = vmatprep.subr.bf16.mxu0 %v1620_v32 }
  0x6a   : > { %691 = vmatprep.subr.bf16.mxu1 %v1620_v32 }
  0x6c   : > { %533 = vmatpush2.bf16.msra.mxu0 %v1625_v33 }
  0x6d   : > { %692 = vmatpush2.bf16.msra.mxu1 %v1625_v33  ;;  %534 = vmatprep.subr.bf16.mxu0 %v1630_v34 }
  0x6e   : > { %693 = vmatprep.subr.bf16.mxu1 %v1630_v34 }
  0x70   : > { %535 = vmatpush2.bf16.msra.mxu0 %v1635_v35 }
  0x71   : > { %694 = vmatpush2.bf16.msra.mxu1 %v1635_v35  ;;  %536 = vmatprep.subr.bf16.mxu0 %v1640_v36 }
  0x72   : > { %695 = vmatprep.subr.bf16.mxu1 %v1640_v36 }
  0x74   : > { %537 = vmatpush2.bf16.msra.mxu0 %v1645_v37 }
  0x75   : > { %696 = vmatpush2.bf16.msra.mxu1 %v1645_v37  ;;  %538 = vmatprep.subr.bf16.mxu0 %v1650_v38 }
  0x76   : > { %697 = vmatprep.subr.bf16.mxu1 %v1650_v38 }
  0x78   : > { %539 = vmatpush2.bf16.msra.mxu0 %v1655_v39 }
  0x79   : > { %698 = vmatpush2.bf16.msra.mxu1 %v1655_v39 }
  0x7a   : > { %826 = vmatprep.subr.bf16.mxu1 %v1497_v6 }
  0xb5   : > { %v341_v61 = vpop.permute.xlu1 %340 }
  0xb6   : > { %v276_v55 = vpop.permute.xlu0 %275 }
  0xb7   : > { %v320_v56 = vmul.bf16 %v312_v53, %v276_v55  ;;  %v321_v57 = vmul.bf16 %v319_v54, %v276_v55 }
  0xb9   : > { %540 = vmatprep.mubr.bf16.mxu0 %v321_v57  ;;  %v346_v6 = vpop.permute.xlu1 %345 }
  0xba   : > { %v281_v58 = vpop.permute.xlu0 %280  ;;  %541 = vmatmul.mubr.bf16.vlgmr.msra.gmra.mxu0 %v320_v56 }
  0xbb   : > { %v323_v59 = vmul.bf16 %v319_v54, %v281_v58  ;;  %v322_v60 = vmul.bf16 %v312_v53, %v281_v58 }
  0xbd   : > { %550 = vmatprep.mubr.bf16.mxu0 %v323_v59  ;;  %v336_v41 = vpop.permute.xlu1 %335 }
  0xbf   : > { %v331_v48 = vpop.permute.xlu0 %330 }
  0xc2   : > { %551 = vmatmul.mubr.bf16.gmra.mxu0 %v322_v60 }
  0xc3   : > { %626 = vmatprep.mubr.bf16.mxu0 %v1786_v0 }
 0x17a   : > { %v542_v62 = vpop.f32.mrf.mxu0 }
 0x17b   : > { %v543_v58 = vadd.f32 %v542_v62, %v331_v48  ;;  %v1799_v62 = vmov 0  }
 0x17c   : > { %v544_v63 = vpop.f32.mrf.mxu0 }
 0x17d   : > { %v545_v51 = vadd.f32 %v544_v63, %v331_v48  ;;  %v1232_v63 = vld [vmem:[%s1780_s2] sm:$0xff]  }
 0x17e   : > { %v546_v4 = vpop.f32.mrf.mxu0 }
 0x17f   : > { %v547_v53 = vadd.f32 %v546_v4, %v336_v41  ;;  %v562_v60 = vmax.f32 %v545_v51, 0.0  ;;  %v1233_v4 = vld [vmem:[%s1780_s2 + $0x8] sm:$0xff]  }
 0x180   : > { %v548_v8 = vpop.f32.mrf.mxu0 }
 0x181   : > { %v549_v44 = vadd.f32 %v548_v8, %v336_v41  ;;  %v563_v0 = vmax.f32 %v547_v53, 0.0  ;;  %v561_v8 = vmax.f32 %v543_v58, 0.0  ;;  %v1235_v53 = vld [vmem:[%s1780_s2 + $0x18] sm:$0xff]  }
 0x182   : > { %v552_v14 = vpop.f32.mrf.mxu0 }
 0x183   : > { %v553_v49 = vadd.f32 %v552_v14, %v341_v61  ;;  %v564_v55 = vmax.f32 %v549_v44, 0.0 }
 0x184   : > { %v554_v40 = vpop.f32.mrf.mxu0 }
 0x185   : > { %v555_v45 = vadd.f32 %v554_v40, %v341_v61  ;;  %v565_v59 = vmax.f32 %v553_v49, 0.0  ;;  %v574_v39 = vpack.c.bf16 %v564_v55, %v562_v60  ;;  %v573_v61 = vpack.c.bf16 %v563_v0, %v561_v8 }
 0x186   : > { %v556_v43 = vpop.f32.mrf.mxu0  ;;  %v1338_v55 = vmov 4  }
 0x187   : > { %v557_v47 = vadd.f32 %v556_v43, %v346_v6  ;;  %v566_v56 = vmax.f32 %v555_v45, 0.0 }
 0x188   : > { %v558_v50 = vpop.f32.mrf.mxu0 }
 0x189   : > { %v559_v52 = vadd.f32 %v558_v50, %v346_v6  ;;  %v567_v54 = vmax.f32 %v557_v47, 0.0 }
 0x18b   : > { %v568_v57 = vmax.f32 %v559_v52, 0.0  ;;  %v575_v46 = vpack.c.bf16 %v567_v54, %v565_v59  ;;  %v1234_v52 = vld [vmem:[%s1780_s2 + $0x10] sm:$0xff]   ;;  %v1337_v54 = vmov 3  }
 0x18d   : > { %v576_v42 = vpack.c.bf16 %v568_v57, %v566_v56  ;;  %v929_v56 = vld [vmem:[%s1781_s3] sm:$0x1]  ;;  %v1339_v57 = vmov 5  }
 0x18f   : > { %606 = vmatprep.subr.bf16.mxu0 %v576_v42 }
 0x190   : > { %607 = vmatpush1.bf16.msra.mxu0 %v575_v46 }
 0x191   : > { %608 = vmatprep.subr.bf16.mxu0 %v574_v39  ;;  %v1336_v39 = vmov 2  }
 0x192   : > { %1177 = vset.pattern.permute.xlu1 %v1336_v39  ;;  %1178 = vset.pattern.permute.xlu0 %v1336_v39 }
 0x193   : > { %660 = vperm.xlu1 %1177, %v1487_v3   ;;  %664 = vperm.xlu0 %1178, %v1494_v5  }
 0x194   : > { %609 = vmatpush1.bf16.msra.mxu0 %v573_v61 }
 0x197   : > { %1102 = vmatmul.mubr.msk.bf16.vlgmr.msra.gmra.mxu0 %vm587_vm0, %v1232_v63  ;;  %652 = vperm.xlu1 %1177, %v1477_v1  }
 0x198   : > { %636 = vmatprep.mubr.bf16.mxu0 %v1799_v62  ;;  %1179 = vset.pattern.permute.xlu0 %v1337_v54 }
 0x199   : > { %811 = vperm.xlu0 %1179, %v1477_v1  }
 0x19b   : > { %656 = vperm.xlu1 %1177, %v1482_v2  }
 0x19d   : > { %823 = vperm.xlu0 %1179, %v1494_v5  }
 0x19f   : > { %1103 = vmatmul.mubr.msk.bf16.gmra.mxu0 %vm587_vm0, %v1233_v4  ;;  %1180 = vset.pattern.permute.xlu1 %v1337_v54 }
 0x1a0   : > { %785 = vmatprep.mubr.bf16.mxu0 %v1799_v62  ;;  %815 = vperm.xlu1 %1180, %v1482_v2  }
 0x1a1   : > { %1182 = vset.pattern.permute.xlu0 %v1338_v55 }
 0x1a2   : > { %892 = vperm.xlu0 %1182, %v1482_v2  }
 0x1a4   : > { %819 = vperm.xlu1 %1180, %v1487_v3  }
 0x1a6   : > { %1183 = vset.pattern.permute.xlu0 %v1339_v57 }
 0x1a7   : > { %932 = vperm.xlu0 %1183, %v929_v56  }
 0x1a8   : > { %1181 = vset.pattern.permute.xlu1 %v1338_v55 }
 0x1a9   : > { %888 = vperm.xlu1 %1181, %v1477_v1  }
 0x1ad   : > { %896 = vperm.xlu1 %1181, %v1487_v3  }
 0x1b1   : > { %900 = vperm.xlu1 %1181, %v1494_v5  }
 0x257   : > { %v628_v0 = vpop.f32.mrf.mxu0 }
 0x259   : > { %v630_v42 = vpop.f32.mrf.mxu0 }
 0x25b   : > { %v632_v46 = vpop.f32.mrf.mxu0 }
 0x25c   : > { %v647_v40 = vpack.c.bf16 %v632_v46, %v628_v0 }
 0x25d   : > { %v634_v6 = vpop.f32.mrf.mxu0 }
 0x25e   : > { %v648_v14 = vpack.c.bf16 %v634_v6, %v630_v42 }
 0x25f   : > { %v638_v41 = vpop.f32.mrf.mxu0 }
 0x260   : > { %699 = vmatprep.mubr.bf16.mxu1 %v648_v14 }
 0x261   : > { %v640_v43 = vpop.f32.mrf.mxu0  ;;  %700 = vmatmul.mubr.bf16.vlgmr.msra.gmra.mxu1 %v647_v40 }
 0x262   : > { %827 = vmatpush1.bf16.msra.mxu1 %v1500_v7  ;;  %v1800_v7 = vld [vmem:[#allocation8_spill] sm:$0xff] }
 0x263   : > { %v642_v44 = vpop.f32.mrf.mxu0  ;;  %828 = vmatprep.subr.bf16.mxu1 %v1505_v9  ;;  %v661_v9 = vpop.permute.xlu1 %660 }
 0x264   : > { %v649_v48 = vpack.c.bf16 %v642_v44, %v638_v41 }
 0x265   : > { %v644_v45 = vpop.f32.mrf.mxu0 }
 0x266   : > { %v650_v47 = vpack.c.bf16 %v644_v45, %v640_v43  ;;  %829 = vmatpush1.bf16.msra.mxu1 %v1511_v10 }
 0x267   : > { %830 = vmatprep.subr.bf16.mxu1 %v1516_v11 }
 0x268   : > { %709 = vmatprep.mubr.bf16.mxu1 %v650_v47 }
 0x269   : > { %710 = vmatmul.mubr.bf16.gmra.mxu1 %v649_v48 }
 0x26a   : > { %831 = vmatpush1.bf16.msra.mxu1 %v1521_v12 }
 0x26b   : > { %832 = vmatprep.subr.bf16.mxu1 %v1526_v13  ;;  %v653_v13 = vpop.permute.xlu1 %652 }
 0x26e   : > { %833 = vmatpush1.bf16.msra.mxu1 %v1533_v15 }
 0x26f   : > { %834 = vmatprep.subr.bf16.mxu1 %v1538_v16 }
 0x272   : > { %835 = vmatpush1.bf16.msra.mxu1 %v1544_v17 }
 0x273   : > { %836 = vmatprep.subr.bf16.mxu1 %v1549_v18  ;;  %v665_v18 = vpop.permute.xlu0 %664 }
 0x276   : > { %837 = vmatpush1.bf16.msra.mxu1 %v1555_v19  ;;  %v657_v19 = vpop.permute.xlu1 %656 }
 0x277   : > { %838 = vmatprep.subr.bf16.mxu1 %v1560_v20  ;;  %v812_v42 = vpop.permute.xlu0 %811 }
 0x27a   : > { %839 = vmatpush1.bf16.msra.mxu1 %v1564_v21  ;;  %v816_v3 = vpop.permute.xlu1 %815 }
 0x27b   : > { %840 = vmatprep.subr.bf16.mxu1 %v1570_v22  ;;  %v824_v14 = vpop.permute.xlu0 %823 }
 0x27e   : > { %841 = vmatpush1.bf16.msra.mxu1 %v1575_v23  ;;  %v820_v46 = vpop.permute.xlu1 %819 }
 0x27f   : > { %842 = vmatprep.subr.bf16.mxu1 %v1580_v24 }
 0x282   : > { %843 = vmatpush2.bf16.msra.mxu1 %v1585_v25  ;;  %v889_v43 = vpop.permute.xlu1 %888 }
 0x283   : > { %844 = vmatprep.subr.bf16.mxu1 %v1590_v26 }
 0x286   : > { %845 = vmatpush2.bf16.msra.mxu1 %v1595_v27 }
 0x287   : > { %846 = vmatprep.subr.bf16.mxu1 %v1600_v28 }
 0x28a   : > { %847 = vmatpush2.bf16.msra.mxu1 %v1605_v29 }
 0x28b   : > { %848 = vmatprep.subr.bf16.mxu1 %v1610_v30 }
 0x28e   : > { %849 = vmatpush2.bf16.msra.mxu1 %v1615_v31 }
 0x28f   : > { %850 = vmatprep.subr.bf16.mxu1 %v1620_v32 }
 0x292   : > { %851 = vmatpush2.bf16.msra.mxu1 %v1625_v33 }
 0x293   : > { %852 = vmatprep.subr.bf16.mxu1 %v1630_v34 }
 0x296   : > { %853 = vmatpush2.bf16.msra.mxu1 %v1635_v35 }
 0x297   : > { %854 = vmatprep.subr.bf16.mxu1 %v1640_v36 }
 0x29a   : > { %855 = vmatpush2.bf16.msra.mxu1 %v1645_v37 }
 0x29b   : > { %856 = vmatprep.subr.bf16.mxu1 %v1650_v38 }
 0x29e   : > { %857 = vmatpush2.bf16.msra.mxu1 %v1800_v7 }
 0x321   : > { %v701_v10 = vpop.f32.mrf.mxu1 }
 0x322   : > { %v702_v33 = vadd.f32 %v701_v10, %v653_v13  ;;  %v893_v10 = vpop.permute.xlu0 %892 }
 0x323   : > { %v703_v11 = vpop.f32.mrf.mxu1 }
 0x324   : > { %v704_v26 = vadd.f32 %v703_v11, %v653_v13  ;;  %v720_v50 = vmax.f32 %v702_v33, 0.0 }
 0x325   : > { %v705_v12 = vpop.f32.mrf.mxu1 }
 0x326   : > { %v706_v28 = vadd.f32 %v705_v12, %v657_v19  ;;  %v721_v35 = vmax.f32 %v704_v26, 0.0 }
 0x327   : > { %v707_v15 = vpop.f32.mrf.mxu1 }
 0x328   : > { %v708_v21 = vadd.f32 %v707_v15, %v657_v19  ;;  %v722_v37 = vmax.f32 %v706_v28, 0.0 }
 0x329   : > { %v711_v16 = vpop.f32.mrf.mxu1 }
 0x32a   : > { %v712_v24 = vadd.f32 %v711_v16, %v661_v9  ;;  %v723_v30 = vmax.f32 %v708_v21, 0.0  ;;  %v733_v51 = vpack.c.bf16 %v722_v37, %v720_v50 }
 0x32b   : > { %v713_v17 = vpop.f32.mrf.mxu1 }
 0x32c   : > { %v714_v22 = vadd.f32 %v713_v17, %v661_v9  ;;  %v724_v34 = vmax.f32 %v712_v24, 0.0  ;;  %v734_v49 = vpack.c.bf16 %v723_v30, %v721_v35  ;;  %v897_v17 = vpop.permute.xlu1 %896 }
 0x32d   : > { %v715_v20 = vpop.f32.mrf.mxu1 }
 0x32e   : > { %v716_v23 = vadd.f32 %v715_v20, %v665_v18  ;;  %v725_v31 = vmax.f32 %v714_v22, 0.0 }
 0x32f   : > { %v717_v25 = vpop.f32.mrf.mxu1 }
 0x330   : > { %v718_v27 = vadd.f32 %v717_v25, %v665_v18  ;;  %v726_v29 = vmax.f32 %v716_v23, 0.0  ;;  %v901_v33 = vpop.permute.xlu1 %900 }
 0x332   : > { %v727_v32 = vmax.f32 %v718_v27, 0.0  ;;  %v735_v38 = vpack.c.bf16 %v726_v29, %v724_v34 }
 0x334   : > { %v736_v36 = vpack.c.bf16 %v727_v32, %v725_v31 }
 0x336   : > { %765 = vmatprep.subr.bf16.mxu0 %v736_v36 }
 0x337   : > { %766 = vmatpush1.bf16.msra.mxu0 %v735_v38 }
 0x338   : > { %767 = vmatprep.subr.bf16.mxu0 %v734_v49 }
 0x33b   : > { %768 = vmatpush1.bf16.msra.mxu0 %v733_v51 }
 0x33e   : > { %1110 = vmatmul.mubr.msk.bf16.vlgmr.msra.gmra.mxu0 %vm587_vm0, %v1234_v52 }
 0x33f   : > { %795 = vmatprep.mubr.bf16.mxu0 %v1799_v62 }
 0x346   : > { %1111 = vmatmul.mubr.msk.bf16.gmra.mxu0 %vm587_vm0, %v1235_v53 }
 0x3fe   : > { %v787_v58 = vpop.f32.mrf.mxu0 }
 0x400   : > { %v789_v59 = vpop.f32.mrf.mxu0 }
 0x402   : > { %v791_v60 = vpop.f32.mrf.mxu0 }
 0x403   : > { %v806_v63 = vpack.c.bf16 %v791_v60, %v787_v58 }
 0x404   : > { %v793_v8 = vpop.f32.mrf.mxu0 }
 0x405   : > { %v807_v61 = vpack.c.bf16 %v793_v8, %v789_v59 }
 0x406   : > { %v797_v1 = vpop.f32.mrf.mxu0 }
 0x407   : > { %858 = vmatprep.mubr.bf16.mxu1 %v807_v61 }
 0x408   : > { %v799_v2 = vpop.f32.mrf.mxu0  ;;  %859 = vmatmul.mubr.bf16.vlgmr.msra.gmra.mxu1 %v806_v63  ;;  %v933_v63 = vpop.permute.xlu0 %932 }
 0x40a   : > { %v801_v62 = vpop.f32.mrf.mxu0 }
 0x40b   : > { %v808_v0 = vpack.c.bf16 %v801_v62, %v797_v1 }
 0x40c   : > { %v803_v4 = vpop.f32.mrf.mxu0 }
 0x40d   : > { %v809_v39 = vpack.c.bf16 %v803_v4, %v799_v2 }
 0x40f   : > { %868 = vmatprep.mubr.bf16.mxu1 %v809_v39  ;;  %v1801_v39 = vld [vmem:[#allocation9_spill] sm:$0xff] }
 0x410   : > { %869 = vmatmul.mubr.bf16.gmra.mxu1 %v808_v0 }
 0x4c8   : > { %v860_v5 = vpop.f32.mrf.mxu1 }
 0x4c9   : > { %v861_v40 = vadd.f32 %v860_v5, %v812_v42 }
 0x4ca   : > { %v862_v6 = vpop.f32.mrf.mxu1 }
 0x4cb   : > { %v863_v45 = vadd.f32 %v862_v6, %v812_v42  ;;  %v879_v9 = vmax.f32 %v861_v40, 0.0 }
 0x4cc   : > { %v864_v41 = vpop.f32.mrf.mxu1 }
 0x4cd   : > { %v865_v44 = vadd.f32 %v864_v41, %v816_v3  ;;  %v880_v15 = vmax.f32 %v863_v45, 0.0  ;;  %v903_v21 = vmul.f32 %v889_v43, %v879_v9 }
 0x4ce   : > { %v866_v47 = vpop.f32.mrf.mxu1 }
 0x4cf   : > { %v881_v48 = vmax.f32 %v865_v44, 0.0  ;;  %v867_v7 = vadd.f32 %v866_v47, %v816_v3  ;;  %v904_v27 = vmul.f32 %v889_v43, %v880_v15  ;;  %v1802_v3 = vlaneseq }
 0x4d0   : > { %v870_v11 = vpop.f32.mrf.mxu1 }
 0x4d1   : > { %v882_v12 = vmax.f32 %v867_v7, 0.0  ;;  %v871_v13 = vadd.f32 %v870_v11, %v820_v46  ;;  %v905_v18 = vmul.f32 %v893_v10, %v881_v48  ;;  %vm957_vm1 = vcmp.lt.s32.totalorder %v1802_v3, 256 }
 0x4d2   : > { %v872_v16 = vpop.f32.mrf.mxu1 }
 0x4d3   : > { %v883_v19 = vmax.f32 %v871_v13, 0.0  ;;  %v873_v20 = vadd.f32 %v872_v16, %v820_v46  ;;  %v906_v23 = vmul.f32 %v893_v10, %v882_v12  ;;  %v911_v29 = vadd.f32 %v905_v18, %v903_v21 }
 0x4d4   : > { %v874_v22 = vpop.f32.mrf.mxu1 }
 0x4d5   : > { %v884_v24 = vmax.f32 %v873_v20, 0.0  ;;  %v907_v25 = vmul.f32 %v897_v17, %v883_v19  ;;  %v875_v26 = vadd.f32 %v874_v22, %v824_v14  ;;  %v920_v34 = vadd.f32 %v906_v23, %v904_v27 }
 0x4d6   : > { %v876_v28 = vpop.f32.mrf.mxu1 }
 0x4d7   : > { %v908_v30 = vmul.f32 %v897_v17, %v884_v24  ;;  %v885_v31 = vmax.f32 %v875_v26, 0.0  ;;  %v877_v32 = vadd.f32 %v876_v28, %v824_v14  ;;  %v912_v35 = vadd.f32 %v911_v29, %v907_v25 }
 0x4d9   : > { %v886_v36 = vmax.f32 %v877_v32, 0.0  ;;  %v909_v37 = vmul.f32 %v901_v33, %v885_v31  ;;  %v921_v38 = vadd.f32 %v920_v34, %v908_v30 }
 0x4db   : > { %v910_v49 = vmul.f32 %v901_v33, %v886_v36  ;;  %v913_v50 = vadd.f32 %v912_v35, %v909_v37 }
 0x4dd   : > { %v914_v51 = vrot.slane %v913_v50, 4  ;;  %v922_v52 = vadd.f32 %v921_v38, %v910_v49 }
 0x4df   : > { %v915_v53 = vadd.f32 %v914_v51, %v913_v50  ;;  %v923_v54 = vrot.slane %v922_v52, 4 }
 0x4e1   : > { %v924_v55 = vadd.f32 %v923_v54, %v922_v52  ;;  %v916_v56 = vrot.slane %v915_v53, 2 }
 0x4e3   : > { %v917_v57 = vadd.f32 %v916_v56, %v915_v53  ;;  %v925_v58 = vrot.slane %v924_v55, 2 }
 0x4e5   : > { %v918_v59 = vrot.slane %v917_v57, 1  ;;  %v926_v60 = vadd.f32 %v925_v58, %v924_v55 }
 0x4e7   : > { %v919_v8 = vadd.f32 %v918_v59, %v917_v57  ;;  %v927_v61 = vrot.slane %v926_v60, 1 }
 0x4e9   : > { %v928_v1 = vadd.f32 %v927_v61, %v926_v60  ;;  %v935_v2 = vadd.f32 %v933_v63, %v919_v8 }
 0x4eb   : > { %v936_v62 = vadd.f32 %v933_v63, %v928_v1 }
 0x4ed   : > { %v939_v4 = vcombine.low %v935_v2, %v936_v62 }
 0x4ef   : > { %v946_v0 = vrot.slane %v939_v4, %v1801_v39 }
 0x4f1   : > { %v953_v42 = vrot.slane %v946_v0, %v1801_v39 }
 0x4f3   : > { %959 = vst.msk [vmem:[%s228_s5] sm:$0x3] %vm957_vm1, %v953_v42 }
 0x4f4   : > { %1277 = shalt.err (!%p1274_p0)
}
 0x4f5   : > { %s1278_s11 = scalar_lea.hbm %s973_s14, 32  ;;  %s1282_s26 = scalar_lea.hbm %s1782_s4, 64 }
 0x4f6   : > { %p1279_p2 = scmp.ne.s32.totalorder %s973_s14, %s1278_s11  ;;  %p1283_p3 = scmp.lt.s32.totalorder %s973_s14, %s1782_s4 }
 0x4f7   : > { %p1284_p6 = scmp.lt.s32.totalorder %s1282_s26, %s1278_s11 }
 0x4f8   : > { %p1280_p9 = pnand %p1279_p2, %p1803_p13 }
 0x4f9   : > { %p1285_p11 = por %p1284_p6, %p1283_p3 }
 0x4fa   : > { %p1281_p1 = pneg %p1280_p9 }
 0x4fc   : > { %p1286_p12 = pnand %p1285_p11, %p1281_p1 }
 0x4fe   : > { %1289 = shalt.err (!%p1286_p12)
}
 0x4ff   : > { %1121 = dma.vmem_to_hbm [thread:$0]  (%p1803_p13), %s976_s6, 32, %s973_s14, %s961_s20  }
 0x500 PF: > { %s987_s29 = sand.u32 1, %s1316_s15   ;;  %p1804_p4 = scmp.ne.s32.totalorder %s1794_s28, 0 }
 0x501   : > { %p1805_p5 = scmp.ge.s32.totalorder %s1328_s18, 2  ;;  %s988_s30 = scalar_lea.sflag [#allocation4], %s987_s29 }
 0x503   : > { %p1128_p7 = pnand %p1805_p5, %p1804_p4 }
 0x505   : > { %p1129_p8 = pneg %p1128_p7 }
 0x507   : > { %1311 = dma.done.wait (%p1129_p8), %s988_s30, 32  }
 0x508   : > { %1313 = vsyncadd (%p1129_p8), %s988_s30, 4294967264  ;;  %p17_p10 = scmp.ge.s32.totalorder %s1391_s21, 4   ;;  %s1806_s15 = smov %s1320_s16 }
 0x509   : > { %s1807_s16 = smov %s1324_s17  ;;  %s1808_s17 = smov %s1403_s24 }
 0x50a   : > { %s1809_s18 = smov %s1391_s21  ;;  %19 = sbr.rel (!%p17_p10) target bundleno = 5 (0x5), region = 85 }
 0x50f   :  { %993 = vsyncpa [#allocation3], 1 }
 0x510   :  { %995 = vsyncpa [#allocation3 + $0x1], 1 }
 0x511   :  { %996 = vsyncpa [#allocation4], 1 }
 0x512   :  { %998 = vsyncpa [#allocation4 + $0x1], 1 }

</bundles_post_ra>
